<compile_context>
chip_gen: v6e
topology: v6e:2x2x1
jax: 0.10.0
libtpu: 0.0.40
codegen_flags: <defaults>
</compile_context>

<pallas_src>
import numpy as np
import jax
import jax.numpy as jnp
from jax.experimental import pallas as pl
from jax.experimental.pallas import tpu as pltpu


# ----------------------------------------------------------------------------
# Deterministic weight/bias construction (mirrors the PyTorch __init__ code).
# ----------------------------------------------------------------------------
def first_layer(size_in, size_out):
    w = np.zeros((size_out, size_in), np.float32)
    b = np.zeros((size_out,), np.float32)
    block = size_out // 2
    for i in range(size_out):
        w[i, i // block] = 1.0
    for i in range(size_out // block):
        for j in range(block):
            b[i * block + j] = j
    return w, b


def second_layer(size_in, size_out):
    w = np.zeros((size_out, size_in), np.float32)
    b = np.zeros((size_out,), np.float32)
    block = size_out // size_in
    inner = block // 2
    for i in range(size_in):
        for j in range(2):
            sgn_w = -1.0 if j == 0 else 1.0
            for k in range(inner):
                w[i * block + j * inner + k, i] = sgn_w
    for i in range(size_in):
        for j in range(2):
            sgn_b = 1.0 if j % 2 == 0 else -1.0
            for k in range(inner):
                b[i * block + j * inner + k] = sgn_b * (k + 1)
    return w, b


def third_layer(size_in, size_out, image_shape):
    w = np.zeros((size_out, size_in), np.float32)
    block_size = image_shape[1]
    block_num = size_out // block_size
    for i in range(block_num):
        for j in range(block_size):
            w[i * block_size + j, i * block_size * 2 + j] = -1.0
            w[i * block_size + j, i * block_size * 2 + block_size + j] = -1.0
    b = np.ones((size_out,), np.float32)
    return w, b


def fourth_layer(size_in, size_out):
    w = np.zeros((size_out, size_in), np.float32)
    b = np.zeros((size_out,), np.float32)
    block = size_out // 2
    for i in range(size_out):
        part = i // block
        for j in range(size_in // 2):
            w[part * block + j % block, part * (size_in // 2) + j] = 1.0
    return w, b


def fifth_layer(size_in, size_out, image_np):
    C, H, W = image_np.shape
    w = np.zeros((size_out, size_in), np.float32)
    for ch in range(C):
        for i in range(size_out // C):
            r, c = i // W, i % W
            w[ch * H * W + i, r] = 1.0
            w[ch * H * W + i, size_in // 2 + c] = 1.0
    b = -np.ones((size_out,), np.float32)
    return w, b


def sixth_layer(size_in, size_out, image_np):
    flat = image_np.reshape(-1).astype(np.float32)
    w = np.zeros((size_out, size_in), np.float32)
    for i in range(size_out):
        w[i, i] = -flat[i]
    b = flat.copy()
    return w, b


def build_occlusion_layers(image_np, occlusion_size):
    C, H, W = image_np.shape
    occ_w, _occ_h = occlusion_size
    layers = []
    s_in, s_out = 2, 2 * occ_w
    layers.append(first_layer(s_in, s_out))                       # fc1
    s_in, s_out = s_out, s_out * 2 * W
    layers.append(second_layer(s_in, s_out))                      # fc2
    s_in, s_out = s_out, s_out // 2
    layers.append(third_layer(s_in, s_out, image_np.shape))       # fc3
    s_in, s_out = s_out, H + W
    layers.append(fourth_layer(s_in, s_out))                      # fc4
    s_in, s_out = s_out, C * H * W
    layers.append(fifth_layer(s_in, s_out, image_np))             # fc5
    s_in, s_out = s_out, s_out
    layers.append(sixth_layer(s_in, s_out, image_np))             # fc6 (diag)
    return layers


def _round_up(n, m):
    return ((n + m - 1) // m) * m


# ----------------------------------------------------------------------------
# Pallas kernel: fused fc1..fc5 matmul chain + elementwise fc6 (diagonal).
# ----------------------------------------------------------------------------
def occlusion_kernel(x_ref,
                     w1, b1, w2, b2, w3, b3, w4, b4, w5, b5, flat_ref,
                     o_ref):
    # fc1: tiny f32 matmul (in dim padded only to 8 sublanes).
    v = jnp.dot(x_ref[...], w1[...], preferred_element_type=jnp.float32) + b1[...]
    v = jnp.maximum(v, 0.0)
    # fc2..fc5: bf16 weights (entries are exact 0/±1/small ints), f32 accumulation.
    for w_ref, b_ref in ((w2, b2), (w3, b3), (w4, b4), (w5, b5)):
        v = jnp.dot(v.astype(jnp.bfloat16), w_ref[...],
                    preferred_element_type=jnp.float32) + b_ref[...]
        v = jnp.maximum(v, 0.0)
    # fc6: W = diag(-image_flat), b = image_flat  =>  y = flat * (1 - v).
    # Pure VPU; padded lanes of `flat` are zero so padded output lanes stay zero.
    o_ref[...] = flat_ref[...] * (1.0 - v)


# ----------------------------------------------------------------------------
# One-time builder: pad weights per-layer, move to device, return jitted forward.
# ----------------------------------------------------------------------------
def make_occlusion_forward(image_np, occlusion_size):
    image_np = np.asarray(image_np, np.float32)
    C, H, W = image_np.shape
    chw = C * H * W
    layers = build_occlusion_layers(image_np, occlusion_size)

    IN_PAD = 8  # fc1 input: 2 real values padded to one sublane group (not to CHW!)
    out_dims = [w.shape[0] for (w, _) in layers[:5]]
    out_pads = [_round_up(d, 128) for d in out_dims]          # lane dim: 128-aligned
    in_pads = [IN_PAD] + out_pads[:-1]                        # chain with previous layer
    OUT_PAD = out_pads[-1]                                    # fc5 out == fc6 out == CHW

    consts = []
    for idx, ((w, b), ip, op) in enumerate(zip(layers[:5], in_pads, out_pads)):
        wt = np.zeros((ip, op), np.float32)
        wt[: w.shape[1], : w.shape[0]] = w.T
        bp = np.zeros((1, op), np.float32)
        bp[0, : b.shape[0]] = b
        w_dev = jnp.asarray(wt)
        if idx > 0:
            # fc2..fc5 values are exact in bf16; fc1 is tiny, keep f32.
            w_dev = w_dev.astype(jnp.bfloat16)
        consts.append(w_dev)
        consts.append(jnp.asarray(bp))
    # fc6 replaced by its diagonal: the flattened image, lane-padded with zeros.
    flat = np.zeros((1, OUT_PAD), np.float32)
    flat[0, :chw] = image_np.reshape(-1)
    consts.append(jnp.asarray(flat))
    consts = tuple(consts)

    const_bytes = sum(int(np.prod(c.shape)) * c.dtype.itemsize for c in consts)

    @jax.jit
    def forward(x):
        """x: (B, 2) float — batch of (row, col) occlusion positions.
        Returns (B, C*H*W): occluded flat image per position (same as module output)."""
        B = x.shape[0]
        if B <= 128:
            B_pad = _round_up(B, 8)
            TB = B_pad
        else:
            B_pad = _round_up(B, 128)
            TB = 128

        x_p = jnp.zeros((B_pad, IN_PAD), jnp.float32)
        x_p = x_p.at[:B, :2].set(x.astype(jnp.float32))

        in_specs = [pl.BlockSpec((TB, IN_PAD), lambda i: (i, 0))]
        in_specs += [pl.BlockSpec(c.shape, lambda i: (0, 0)) for c in consts]
        out_spec = pl.BlockSpec((TB, OUT_PAD), lambda i: (i, 0))

        cp_kwargs = dict(dimension_semantics=("parallel",))
        if const_bytes > 12 * 1024 * 1024:
            # Headroom over the default scoped-VMEM limit for real-image sizes.
            cp_kwargs["vmem_limit_bytes"] = int(2.5 * const_bytes) + (4 << 20)

        out = pl.pallas_call(
            occlusion_kernel,
            out_shape=jax.ShapeDtypeStruct((B_pad, OUT_PAD), jnp.float32),
            grid=(B_pad // TB,),
            in_specs=in_specs,
            out_specs=out_spec,
            compiler_params=pltpu.CompilerParams(**cp_kwargs),
        )(x_p, *consts)
        return out[:B, :chw]

    return forward


# Pure-numpy reference of OcclusionLayer.forward (single position) for verification.
def ref_forward(x, layers):
    v = np.asarray(x, np.float32)
    for idx, (w, b) in enumerate(layers):
        v = w @ v + b
        if idx < len(layers) - 1:
            v = np.maximum(v, 0.0)
    return v


if __name__ == "__main__":
    key = jax.random.PRNGKey(0)
    k_img, k_xy = jax.random.split(key)

    # Small deterministic image (C, H, W) and occlusion size (width, height).
    C, H, W = 3, 6, 6
    occlusion_size = (2, 2)
    image = jax.random.uniform(k_img, (C, H, W), dtype=jnp.float32)
    image_np = np.asarray(image)

    # Batch of occlusion top-left (row, col) positions.
    B = 8
    rc = jax.random.randint(k_xy, (B, 2), 0, min(H, W) - 1)
    x = rc.astype(jnp.float32)

    # Build device-resident constants + jitted forward ONCE.
    forward = make_occlusion_forward(image_np, occlusion_size)

    y = jax.block_until_ready(forward(x))
    y_np = np.asarray(y)
    assert y_np.shape == (B, C * H * W)

    # Verify each batch row against the dense 6-layer reference (including dense fc6).
    layers = build_occlusion_layers(image_np, occlusion_size)
    x_np = np.asarray(x)
    for bidx in range(B):
        ref = ref_forward(x_np[bidx], layers)
        assert np.allclose(y_np[bidx], ref, rtol=1e-5, atol=1e-5), f"mismatch at row {bidx}"

    print("KERNEL_OK")
</pallas_src>

<mosaic_0001>
module attributes {stable_mosaic.version = 11 : i64} {
  func.func @occlusion_kernel(%arg0: i32, %arg1: memref<8x8xf32, #tpu.memory_space<vmem>>, %arg2: memref<8x128xf32, #tpu.memory_space<vmem>>, %arg3: memref<1x128xf32, #tpu.memory_space<vmem>>, %arg4: memref<128x128xbf16, #tpu.memory_space<vmem>>, %arg5: memref<1x128xf32, #tpu.memory_space<vmem>>, %arg6: memref<128x128xbf16, #tpu.memory_space<vmem>>, %arg7: memref<1x128xf32, #tpu.memory_space<vmem>>, %arg8: memref<128x128xbf16, #tpu.memory_space<vmem>>, %arg9: memref<1x128xf32, #tpu.memory_space<vmem>>, %arg10: memref<128x128xbf16, #tpu.memory_space<vmem>>, %arg11: memref<1x128xf32, #tpu.memory_space<vmem>>, %arg12: memref<1x128xf32, #tpu.memory_space<vmem>>, %arg13: memref<8x128xf32, #tpu.memory_space<vmem>>) attributes {dimension_semantics = [#tpu.dimension_semantics<parallel>], iteration_bounds = array<i64: 1>, scalar_prefetch = 0 : i64, scratch_operands = 0 : i64, tpu.core_type = #tpu.core_type<tc>, window_params = [{transform_indices = @transform_0, window_bounds = array<i64: 8, 8>}, {pipeline_mode = #tpu.pipeline_mode<synchronous>, transform_indices = @transform_1, window_bounds = array<i64: 8, 128>}, {pipeline_mode = #tpu.pipeline_mode<synchronous>, transform_indices = @transform_2, window_bounds = array<i64: 1, 128>}, {pipeline_mode = #tpu.pipeline_mode<synchronous>, transform_indices = @transform_3, window_bounds = array<i64: 128, 128>}, {pipeline_mode = #tpu.pipeline_mode<synchronous>, transform_indices = @transform_4, window_bounds = array<i64: 1, 128>}, {pipeline_mode = #tpu.pipeline_mode<synchronous>, transform_indices = @transform_5, window_bounds = array<i64: 128, 128>}, {pipeline_mode = #tpu.pipeline_mode<synchronous>, transform_indices = @transform_6, window_bounds = array<i64: 1, 128>}, {pipeline_mode = #tpu.pipeline_mode<synchronous>, transform_indices = @transform_7, window_bounds = array<i64: 128, 128>}, {pipeline_mode = #tpu.pipeline_mode<synchronous>, transform_indices = @transform_8, window_bounds = array<i64: 1, 128>}, {pipeline_mode = #tpu.pipeline_mode<synchronous>, transform_indices = @transform_9, window_bounds = array<i64: 128, 128>}, {pipeline_mode = #tpu.pipeline_mode<synchronous>, transform_indices = @transform_10, window_bounds = array<i64: 1, 128>}, {pipeline_mode = #tpu.pipeline_mode<synchronous>, transform_indices = @transform_11, window_bounds = array<i64: 1, 128>}, {transform_indices = @transform_12, window_bounds = array<i64: 8, 128>}]} {
    %c0 = arith.constant 0 : index
    %c0_0 = arith.constant 0 : index
    %0 = vector.load %arg1[%c0, %c0_0] : memref<8x8xf32, #tpu.memory_space<vmem>>, vector<8x8xf32>
    %c0_1 = arith.constant 0 : index
    %c0_2 = arith.constant 0 : index
    %1 = vector.load %arg2[%c0_1, %c0_2] : memref<8x128xf32, #tpu.memory_space<vmem>>, vector<8x128xf32>
    %cst = arith.constant dense<0.000000e+00> : vector<8x128xf32>
    %2 = tpu.matmul %0, %1, %cst {dimension_numbers = #tpu.dot_dimension_numbers<[1], [0], [0], [1], [0, 0, 1, 1], [], []>} : vector<8x8xf32>, vector<8x128xf32>, vector<8x128xf32> -> vector<8x128xf32>
    %c0_3 = arith.constant 0 : index
    %c0_4 = arith.constant 0 : index
    %3 = vector.load %arg3[%c0_3, %c0_4] : memref<1x128xf32, #tpu.memory_space<vmem>>, vector<1x128xf32>
    %4 = vector.broadcast %3 : vector<1x128xf32> to vector<8x128xf32>
    %5 = arith.addf %2, %4 : vector<8x128xf32>
    %cst_5 = arith.constant 0.000000e+00 : f32
    %6 = vector.broadcast %cst_5 : f32 to vector<8x128xf32>
    %7 = arith.maximumf %5, %6 : vector<8x128xf32>
    %8 = arith.truncf %7 : vector<8x128xf32> to vector<8x128xbf16>
    %c0_6 = arith.constant 0 : index
    %c0_7 = arith.constant 0 : index
    %9 = vector.load %arg4[%c0_6, %c0_7] : memref<128x128xbf16, #tpu.memory_space<vmem>>, vector<128x128xbf16>
    %cst_8 = arith.constant dense<0.000000e+00> : vector<8x128xf32>
    %10 = tpu.matmul %8, %9, %cst_8 {dimension_numbers = #tpu.dot_dimension_numbers<[1], [0], [0], [1], [0, 0, 1, 1], [], []>} : vector<8x128xbf16>, vector<128x128xbf16>, vector<8x128xf32> -> vector<8x128xf32>
    %c0_9 = arith.constant 0 : index
    %c0_10 = arith.constant 0 : index
    %11 = vector.load %arg5[%c0_9, %c0_10] : memref<1x128xf32, #tpu.memory_space<vmem>>, vector<1x128xf32>
    %12 = vector.broadcast %11 : vector<1x128xf32> to vector<8x128xf32>
    %13 = arith.addf %10, %12 : vector<8x128xf32>
    %cst_11 = arith.constant 0.000000e+00 : f32
    %14 = vector.broadcast %cst_11 : f32 to vector<8x128xf32>
    %15 = arith.maximumf %13, %14 : vector<8x128xf32>
    %16 = arith.truncf %15 : vector<8x128xf32> to vector<8x128xbf16>
    %c0_12 = arith.constant 0 : index
    %c0_13 = arith.constant 0 : index
    %17 = vector.load %arg6[%c0_12, %c0_13] : memref<128x128xbf16, #tpu.memory_space<vmem>>, vector<128x128xbf16>
    %cst_14 = arith.constant dense<0.000000e+00> : vector<8x128xf32>
    %18 = tpu.matmul %16, %17, %cst_14 {dimension_numbers = #tpu.dot_dimension_numbers<[1], [0], [0], [1], [0, 0, 1, 1], [], []>} : vector<8x128xbf16>, vector<128x128xbf16>, vector<8x128xf32> -> vector<8x128xf32>
    %c0_15 = arith.constant 0 : index
    %c0_16 = arith.constant 0 : index
    %19 = vector.load %arg7[%c0_15, %c0_16] : memref<1x128xf32, #tpu.memory_space<vmem>>, vector<1x128xf32>
    %20 = vector.broadcast %19 : vector<1x128xf32> to vector<8x128xf32>
    %21 = arith.addf %18, %20 : vector<8x128xf32>
    %cst_17 = arith.constant 0.000000e+00 : f32
    %22 = vector.broadcast %cst_17 : f32 to vector<8x128xf32>
    %23 = arith.maximumf %21, %22 : vector<8x128xf32>
    %24 = arith.truncf %23 : vector<8x128xf32> to vector<8x128xbf16>
    %c0_18 = arith.constant 0 : index
    %c0_19 = arith.constant 0 : index
    %25 = vector.load %arg8[%c0_18, %c0_19] : memref<128x128xbf16, #tpu.memory_space<vmem>>, vector<128x128xbf16>
    %cst_20 = arith.constant dense<0.000000e+00> : vector<8x128xf32>
    %26 = tpu.matmul %24, %25, %cst_20 {dimension_numbers = #tpu.dot_dimension_numbers<[1], [0], [0], [1], [0, 0, 1, 1], [], []>} : vector<8x128xbf16>, vector<128x128xbf16>, vector<8x128xf32> -> vector<8x128xf32>
    %c0_21 = arith.constant 0 : index
    %c0_22 = arith.constant 0 : index
    %27 = vector.load %arg9[%c0_21, %c0_22] : memref<1x128xf32, #tpu.memory_space<vmem>>, vector<1x128xf32>
    %28 = vector.broadcast %27 : vector<1x128xf32> to vector<8x128xf32>
    %29 = arith.addf %26, %28 : vector<8x128xf32>
    %cst_23 = arith.constant 0.000000e+00 : f32
    %30 = vector.broadcast %cst_23 : f32 to vector<8x128xf32>
    %31 = arith.maximumf %29, %30 : vector<8x128xf32>
    %32 = arith.truncf %31 : vector<8x128xf32> to vector<8x128xbf16>
    %c0_24 = arith.constant 0 : index
    %c0_25 = arith.constant 0 : index
    %33 = vector.load %arg10[%c0_24, %c0_25] : memref<128x128xbf16, #tpu.memory_space<vmem>>, vector<128x128xbf16>
    %cst_26 = arith.constant dense<0.000000e+00> : vector<8x128xf32>
    %34 = tpu.matmul %32, %33, %cst_26 {dimension_numbers = #tpu.dot_dimension_numbers<[1], [0], [0], [1], [0, 0, 1, 1], [], []>} : vector<8x128xbf16>, vector<128x128xbf16>, vector<8x128xf32> -> vector<8x128xf32>
    %c0_27 = arith.constant 0 : index
    %c0_28 = arith.constant 0 : index
    %35 = vector.load %arg11[%c0_27, %c0_28] : memref<1x128xf32, #tpu.memory_space<vmem>>, vector<1x128xf32>
    %36 = vector.broadcast %35 : vector<1x128xf32> to vector<8x128xf32>
    %37 = arith.addf %34, %36 : vector<8x128xf32>
    %cst_29 = arith.constant 0.000000e+00 : f32
    %38 = vector.broadcast %cst_29 : f32 to vector<8x128xf32>
    %39 = arith.maximumf %37, %38 : vector<8x128xf32>
    %c0_30 = arith.constant 0 : index
    %c0_31 = arith.constant 0 : index
    %40 = vector.load %arg12[%c0_30, %c0_31] : memref<1x128xf32, #tpu.memory_space<vmem>>, vector<1x128xf32>
    %cst_32 = arith.constant 1.000000e+00 : f32
    %41 = vector.broadcast %cst_32 : f32 to vector<8x128xf32>
    %42 = arith.subf %41, %39 : vector<8x128xf32>
    %43 = vector.broadcast %40 : vector<1x128xf32> to vector<8x128xf32>
    %44 = arith.mulf %43, %42 : vector<8x128xf32>
    %c0_33 = arith.constant 0 : index
    %c0_34 = arith.constant 0 : index
    %45 = vector.load %arg13[%c0_33, %c0_34] : memref<8x128xf32, #tpu.memory_space<vmem>>, vector<8x128xf32>
    tpu.vector_store %arg13[%c0_33, %c0_34], %44 {strides = array<i32>} : memref<8x128xf32, #tpu.memory_space<vmem>>, vector<8x128xf32>,
    return
  }
  func.func @transform_0(%arg0: i32) -> (i32, i32) {
    %c0_i32 = arith.constant 0 : i32
    %c0_i32_0 = arith.constant 0 : i32
    return %arg0, %c0_i32 : i32, i32
  }
  func.func @transform_1(%arg0: i32) -> (i32, i32) {
    %c0_i32 = arith.constant 0 : i32
    %c0_i32_0 = arith.constant 0 : i32
    %c0_i32_1 = arith.constant 0 : i32
    return %c0_i32, %c0_i32_0 : i32, i32
  }
  func.func @transform_2(%arg0: i32) -> (i32, i32) {
    %c0_i32 = arith.constant 0 : i32
    %c0_i32_0 = arith.constant 0 : i32
    %c0_i32_1 = arith.constant 0 : i32
    return %c0_i32, %c0_i32_0 : i32, i32
  }
  func.func @transform_3(%arg0: i32) -> (i32, i32) {
    %c0_i32 = arith.constant 0 : i32
    %c0_i32_0 = arith.constant 0 : i32
    %c0_i32_1 = arith.constant 0 : i32
    return %c0_i32, %c0_i32_0 : i32, i32
  }
  func.func @transform_4(%arg0: i32) -> (i32, i32) {
    %c0_i32 = arith.constant 0 : i32
    %c0_i32_0 = arith.constant 0 : i32
    %c0_i32_1 = arith.constant 0 : i32
    return %c0_i32, %c0_i32_0 : i32, i32
  }
  func.func @transform_5(%arg0: i32) -> (i32, i32) {
    %c0_i32 = arith.constant 0 : i32
    %c0_i32_0 = arith.constant 0 : i32
    %c0_i32_1 = arith.constant 0 : i32
    return %c0_i32, %c0_i32_0 : i32, i32
  }
  func.func @transform_6(%arg0: i32) -> (i32, i32) {
    %c0_i32 = arith.constant 0 : i32
    %c0_i32_0 = arith.constant 0 : i32
    %c0_i32_1 = arith.constant 0 : i32
    return %c0_i32, %c0_i32_0 : i32, i32
  }
  func.func @transform_7(%arg0: i32) -> (i32, i32) {
    %c0_i32 = arith.constant 0 : i32
    %c0_i32_0 = arith.constant 0 : i32
    %c0_i32_1 = arith.constant 0 : i32
    return %c0_i32, %c0_i32_0 : i32, i32
  }
  func.func @transform_8(%arg0: i32) -> (i32, i32) {
    %c0_i32 = arith.constant 0 : i32
    %c0_i32_0 = arith.constant 0 : i32
    %c0_i32_1 = arith.constant 0 : i32
    return %c0_i32, %c0_i32_0 : i32, i32
  }
  func.func @transform_9(%arg0: i32) -> (i32, i32) {
    %c0_i32 = arith.constant 0 : i32
    %c0_i32_0 = arith.constant 0 : i32
    %c0_i32_1 = arith.constant 0 : i32
    return %c0_i32, %c0_i32_0 : i32, i32
  }
  func.func @transform_10(%arg0: i32) -> (i32, i32) {
    %c0_i32 = arith.constant 0 : i32
    %c0_i32_0 = arith.constant 0 : i32
    %c0_i32_1 = arith.constant 0 : i32
    return %c0_i32, %c0_i32_0 : i32, i32
  }
  func.func @transform_11(%arg0: i32) -> (i32, i32) {
    %c0_i32 = arith.constant 0 : i32
    %c0_i32_0 = arith.constant 0 : i32
    %c0_i32_1 = arith.constant 0 : i32
    return %c0_i32, %c0_i32_0 : i32, i32
  }
  func.func @transform_12(%arg0: i32) -> (i32, i32) {
    %c0_i32 = arith.constant 0 : i32
    %c0_i32_0 = arith.constant 0 : i32
    return %arg0, %c0_i32 : i32, i32
  }
}

</mosaic_0001>

<bundles_post_ra>
// kernel: forward.1
= control target key start
LH: loop header
LB: loop body
LE: loop exit
PB: predicated region body
PF: predicated region fallthrough
CT: control target
= control target key end

     0   :  { %17 = vsyncpa [#allocation3], 0  ;;  %s1140_s0 = inlined_call_operand.vmem [shape: f32[8,8], index: 0, kind: input, shape index: {}]   ;;  %s1141_s1 = inlined_call_operand.vmem [shape: f32[8,128], index: 1, kind: input, shape index: {}]   ;;  %s1142_s2 = inlined_call_operand.vmem [shape: f32[1,128], index: 2, kind: input, shape index: {}]   ;;  %s1143_s3 = inlined_call_operand.hbm [shape: bf16[128,128], index: 3, kind: input, shape index: {}]   ;;  %s1144_s4 = inlined_call_operand.vmem [shape: f32[1,128], index: 4, kind: input, shape index: {}]   ;;  %s1145_s5 = inlined_call_operand.hbm [shape: bf16[128,128], index: 5, kind: input, shape index: {}]   ;;  %s1146_s6 = inlined_call_operand.vmem [shape: f32[1,128], index: 6, kind: input, shape index: {}]   ;;  %s1147_s7 = inlined_call_operand.hbm [shape: bf16[128,128], index: 7, kind: input, shape index: {}]   ;;  %s1148_s8 = inlined_call_operand.vmem [shape: f32[1,128], index: 8, kind: input, shape index: {}]   ;;  %s1149_s9 = inlined_call_operand.hbm [shape: bf16[128,128], index: 9, kind: input, shape index: {}]   ;;  %s1150_s10 = inlined_call_operand.vmem [shape: f32[1,128], index: 10, kind: input, shape index: {}]   ;;  %s1151_s11 = inlined_call_operand.vmem [shape: f32[1,128], index: 11, kind: input, shape index: {}]   ;;  %s1152_s12 = inlined_call_operand.hbm [shape: f32[8,128], index: 12, kind: output, shape index: {}]  }
   0x1   :  { %18 = vsyncpa [#allocation6], 0 }
   0x2   :  { %19 = vsyncpa [#allocation9], 0 }
   0x3   :  { %20 = vsyncpa [#allocation4], 0  ;;  %s972_s21 = smov [#allocation5]   ;;  %s973_s23 = smov [#allocation2]  }
   0x4   :  { %s46_s22 = sshll.u32 %s972_s21, 4  ;;  %s32_s24 = sshll.u32 %s973_s23, 4  ;;  %s47_s22 = int_to_ptr.vmem [resolvable:$true] %s46_s22  ;;  %s33_s24 = int_to_ptr.vmem [resolvable:$true] %s32_s24 }
   0x5   :  { %s872_s25 = scalar_lea.vmem %s47_s22, 1024  ;;  %p877_p1 = scmp.lt.s32.totalorder %s47_s22, %s47_s22 }
   0x6   :  { %p873_p0 = scmp.ne.s32.totalorder %s47_s22, %s872_s25  ;;  %p878_p2 = scmp.lt.s32.totalorder %s872_s25, %s872_s25 }
   0x8   :  { %p879_p3 = por %p878_p2, %p877_p1 }
   0xa   :  { %p880_p4 = pnand %p879_p3, %p873_p0 }
   0xc   :  { %883 = shalt.err (!%p880_p4)
}
   0xd   :  { %s974_s26 = smov 64   ;;  %s975_s27 = smov 4  }
   0xe   :  { %52 = dma.hbm_to_vmem [thread:$0]  %s1145_s5, 1024, %s47_s22, [#allocation6], %s974_s26, %s974_s26, %s975_s27  }
   0xf   :  { %s892_s30 = scalar_lea.vmem %s33_s24, 1024  ;;  %p897_p6 = scmp.lt.s32.totalorder %s33_s24, %s33_s24 }
  0x10   :  { %p893_p5 = scmp.ne.s32.totalorder %s33_s24, %s892_s30  ;;  %p898_p7 = scmp.lt.s32.totalorder %s892_s30, %s892_s30 }
  0x12   :  { %p899_p8 = por %p898_p7, %p897_p6 }
  0x14   :  { %p900_p9 = pnand %p899_p8, %p893_p5 }
  0x16   :  { %903 = shalt.err (!%p900_p9)
}
  0x17   :  { %38 = dma.hbm_to_vmem [thread:$0]  %s1143_s3, 1024, %s33_s24, [#allocation3], %s974_s26, %s974_s26, %s975_s27  }
  0x18   :  { %s976_s15 = smov [#allocation7]   ;;  %s977_s17 = smov [#allocation8]  }
  0x19   :  { %s60_s16 = sshll.u32 %s976_s15, 4  ;;  %s74_s18 = sshll.u32 %s977_s17, 4  ;;  %s61_s16 = int_to_ptr.vmem [resolvable:$true] %s60_s16  ;;  %s75_s18 = int_to_ptr.vmem [resolvable:$true] %s74_s18 }
  0x1a   :  { %s912_s5 = scalar_lea.vmem %s61_s16, 1024  ;;  %p917_p11 = scmp.lt.s32.totalorder %s61_s16, %s61_s16 }
  0x1b   :  { %p913_p10 = scmp.ne.s32.totalorder %s61_s16, %s912_s5  ;;  %p918_p12 = scmp.lt.s32.totalorder %s912_s5, %s912_s5 }
  0x1d   :  { %p919_p13 = por %p918_p12, %p917_p11 }
  0x1f   :  { %p920_p0 = pnand %p919_p13, %p913_p10 }
  0x21   :  { %923 = shalt.err (!%p920_p0)
}
  0x22   :  { %66 = dma.hbm_to_vmem [thread:$0]  %s1147_s7, 1024, %s61_s16, [#allocation6], %s974_s26, %s974_s26, %s975_s27  }
  0x23   :  { %s932_s3 = scalar_lea.vmem %s75_s18, 1024  ;;  %p937_p2 = scmp.lt.s32.totalorder %s75_s18, %s75_s18 }
  0x24   :  { %p933_p1 = scmp.ne.s32.totalorder %s75_s18, %s932_s3  ;;  %p938_p3 = scmp.lt.s32.totalorder %s932_s3, %s932_s3 }
  0x26   :  { %p939_p4 = por %p938_p3, %p937_p2 }
  0x28   :  { %p940_p5 = pnand %p939_p4, %p933_p1 }
  0x2a   :  { %943 = shalt.err (!%p940_p5)
}
  0x2b   :  { %80 = dma.hbm_to_vmem [thread:$0]  %s1149_s9, 1024, %s75_s18, [#allocation9], %s974_s26, %s974_s26, %s975_s27  }
  0x2c   :  { %964 = dma.done.wait [#allocation3], 1024  }
  0x2d   :  { %965 = vsyncadd [#allocation3], 4294966272 }
  0x2e   :  { %966 = dma.done.wait [#allocation6], 2048  }
  0x2f   :  { %967 = vsyncadd [#allocation6], 4294965248 }
  0x30   :  { %968 = dma.done.wait [#allocation9], 1024  }
  0x31   :  { %969 = vsyncadd [#allocation9], 4294966272  ;;  %v978_v0 = vmov 0.0   ;;  %vm979_vm0 = vmmov 0   ;;  %vm107_vm1 = vcmask 64512   ;;  %v99_v1 = vld [vmem:[%s1141_s1] sm:$0xff] }
  0x32   :  { %738 = vmatprep.subr.mxu0 %v978_v0  ;;  %740 = vmatprep.mubr.msk.f32.mxu0 %vm979_vm0, %v978_v0  ;;  %v98_v2 = vld [vmem:[%s1140_s0] sm:$0xff]  ;;  %v832_v3 = vld [vmem:[#allocation2 + $0x38] sm:$0xff]   ;;  %v833_v4 = vld [vmem:[#allocation2 + $0x30] sm:$0xff]  }
  0x33   :  { %743 = vmatprep.subr.bf16.mxu1 %v978_v0  ;;  %759 = vmatprep.mubr.msk.bf16.mxu1 %vm979_vm0, %v978_v0  ;;  %v834_v5 = vld [vmem:[#allocation2 + $0x28] sm:$0xff]   ;;  %v835_v6 = vld [vmem:[#allocation2 + $0x20] sm:$0xff]   ;;  %v836_v7 = vld [vmem:[#allocation2 + $0x18] sm:$0xff]  }
  0x34   :  { %739 = vmatpush3.msra.mxu0 %v99_v1  ;;  %744 = vmatpush3.bf16.msra.mxu1 %v832_v3  ;;  %v837_v8 = vld [vmem:[#allocation2 + $0x10] sm:$0xff]   ;;  %v838_v9 = vld [vmem:[#allocation2 + $0x8] sm:$0xff]   ;;  %v839_v10 = vld [vmem:[#allocation2] sm:$0xff]  }
  0x35   :  { %741 = vmatmul.mubr.msk.f32.vlgmr.msra.gmra.mxu0 %vm107_vm1, %v98_v2  ;;  %763 = vmatprep.subr.bf16.mxu0 %v978_v0  ;;  %v840_v11 = vld [vmem:[#allocation5 + $0x38] sm:$0xff]   ;;  %v841_v12 = vld [vmem:[#allocation5 + $0x30] sm:$0xff]   ;;  %v842_v13 = vld [vmem:[#allocation5 + $0x28] sm:$0xff]  }
  0x36   :  { %779 = vmatprep.mubr.msk.bf16.mxu0 %vm979_vm0, %v978_v0  ;;  %745 = vmatprep.subr.bf16.mxu1 %v978_v0  ;;  %v843_v14 = vld [vmem:[#allocation5 + $0x20] sm:$0xff]   ;;  %v844_v15 = vld [vmem:[#allocation5 + $0x18] sm:$0xff]   ;;  %v845_v16 = vld [vmem:[#allocation5 + $0x10] sm:$0xff]  }
  0x37   :  { %764 = vmatpush3.bf16.msra.mxu0 %v840_v11  ;;  %v661_v17 = vld [vmem:[%s1142_s2] ss:$0 sm:$0xff]  ;;  %v846_v23 = vld [vmem:[#allocation5 + $0x8] sm:$0xff]   ;;  %v848_v25 = vld [vmem:[#allocation7 + $0x38] sm:$0xff]  }
  0x38   :  { %746 = vmatpush3.bf16.msra.mxu1 %v833_v4  ;;  %765 = vmatprep.subr.bf16.mxu0 %v978_v0  ;;  %v847_v24 = vld [vmem:[#allocation5] sm:$0xff]   ;;  %v849_v26 = vld [vmem:[#allocation7 + $0x30] sm:$0xff]   ;;  %v850_v27 = vld [vmem:[#allocation7 + $0x28] sm:$0xff]  }
  0x39   :  { %747 = vmatprep.subr.bf16.mxu1 %v978_v0  ;;  %v851_v28 = vld [vmem:[#allocation7 + $0x20] sm:$0xff]   ;;  %v852_v29 = vld [vmem:[#allocation7 + $0x18] sm:$0xff]   ;;  %v853_v30 = vld [vmem:[#allocation7 + $0x10] sm:$0xff]  }
  0x3a   :  { %v663_v31 = vld [vmem:[%s1144_s4] ss:$0 sm:$0xff]  ;;  %v854_v39 = vld [vmem:[#allocation7 + $0x8] sm:$0xff]   ;;  %v856_v41 = vld [vmem:[#allocation8 + $0x38] sm:$0xff]  }
  0x3b   :  { %766 = vmatpush3.bf16.msra.mxu0 %v841_v12  ;;  %v855_v40 = vld [vmem:[#allocation7] sm:$0xff]   ;;  %v857_v42 = vld [vmem:[#allocation8 + $0x30] sm:$0xff]   ;;  %v858_v43 = vld [vmem:[#allocation8 + $0x28] sm:$0xff]  }
  0x3c   :  { %748 = vmatpush3.bf16.msra.mxu1 %v834_v5  ;;  %767 = vmatprep.subr.bf16.mxu0 %v978_v0  ;;  %v859_v44 = vld [vmem:[#allocation8 + $0x20] sm:$0xff]   ;;  %v860_v45 = vld [vmem:[#allocation8 + $0x18] sm:$0xff]   ;;  %v861_v46 = vld [vmem:[#allocation8 + $0x10] sm:$0xff]  }
  0x3d   :  { %749 = vmatprep.subr.bf16.mxu1 %v978_v0  ;;  %v672_v47 = vld [vmem:[%s1146_s6] ss:$0 sm:$0xff]  ;;  %v862_v55 = vld [vmem:[#allocation8 + $0x8] sm:$0xff]  }
  0x3e   :  { %v863_v56 = vld [vmem:[#allocation8] sm:$0xff]  }
  0x3f   :  { %768 = vmatpush3.bf16.msra.mxu0 %v842_v13  ;;  %v681_v57 = vld [vmem:[%s1148_s8] ss:$0 sm:$0xff]  ;;  %s980_s8 = smov [#allocation10]  }
  0x40   :  { %750 = vmatpush3.bf16.msra.mxu1 %v835_v6  ;;  %769 = vmatprep.subr.bf16.mxu0 %v978_v0  ;;  %v690_v2 = vld [vmem:[%s1150_s10] ss:$0 sm:$0xff]  ;;  %s650_s14 = sshll.u32 %s980_s8, 4  ;;  %s651_s14 = int_to_ptr.vmem [resolvable:$true] %s650_s14 }
  0x41   :  { %751 = vmatprep.subr.bf16.mxu1 %v978_v0  ;;  %v699_v6 = vld [vmem:[%s1151_s11] ss:$0 sm:$0xff]  ;;  %s944_s15 = scalar_lea.vmem %s651_s14, 128  ;;  %p949_p7 = scmp.lt.s32.totalorder %s651_s14, %s651_s14 }
  0x42   :  { %p945_p6 = scmp.ne.s32.totalorder %s651_s14, %s944_s15  ;;  %p950_p8 = scmp.lt.s32.totalorder %s944_s15, %s944_s15 }
  0x43   :  { %770 = vmatpush3.bf16.msra.mxu0 %v843_v14 }
  0x44   :  { %752 = vmatpush3.bf16.msra.mxu1 %v836_v7  ;;  %771 = vmatprep.subr.bf16.mxu0 %v978_v0  ;;  %p951_p9 = por %p950_p8, %p949_p7 }
  0x45   :  { %753 = vmatprep.subr.bf16.mxu1 %v978_v0 }
  0x46   :  { %p952_p10 = pnand %p951_p9, %p945_p6 }
  0x47   :  { %772 = vmatpush3.bf16.msra.mxu0 %v844_v15 }
  0x48   :  { %754 = vmatpush3.bf16.msra.mxu1 %v837_v8  ;;  %773 = vmatprep.subr.bf16.mxu0 %v978_v0 }
  0x49   :  { %755 = vmatprep.subr.bf16.mxu1 %v978_v0 }
  0x4b   :  { %774 = vmatpush3.bf16.msra.mxu0 %v845_v16 }
  0x4c   :  { %756 = vmatpush3.bf16.msra.mxu1 %v838_v9  ;;  %775 = vmatprep.subr.bf16.mxu0 %v978_v0 }
  0x4d   :  { %757 = vmatprep.subr.bf16.mxu1 %v978_v0 }
  0x4f   :  { %776 = vmatpush3.bf16.msra.mxu0 %v846_v23 }
  0x50   :  { %758 = vmatpush3.bf16.msra.mxu1 %v839_v10  ;;  %777 = vmatprep.subr.bf16.mxu0 %v978_v0 }
  0x51   :  { %783 = vmatprep.subr.bf16.mxu1 %v978_v0 }
  0x53   :  { %778 = vmatpush3.bf16.msra.mxu0 %v847_v24 }
  0x54   :  { %803 = vmatprep.subr.bf16.mxu0 %v978_v0 }
  0xf5   :  { %v177_v18 = vpop.f32.mrf.mxu0 }
  0xf6   :  { %v178_v19 = vadd.f32 %v661_v17, %v177_v18 }
  0xf7   :  { %v742_v20 = vpop.f32.mrf.mxu0 }
  0xf8   :  { %v181_v21 = vmax.f32 %v178_v19, 0.0 }
  0xfa   :  { %v182_v22 = vpack.c.bf16 %v181_v21, %v181_v21 }
  0xfc   :  { %760 = vmatmul.mubr.bf16.vlgmr.msra.gmra.mxu1 %v182_v22 }
  0xfd   :  { %799 = vmatprep.mubr.msk.bf16.mxu1 %vm979_vm0, %v978_v0  ;;  %784 = vmatpush3.bf16.msra.mxu1 %v848_v25 }
  0xfe   :  { %785 = vmatprep.subr.bf16.mxu1 %v978_v0 }
 0x101   :  { %786 = vmatpush3.bf16.msra.mxu1 %v849_v26 }
 0x102   :  { %787 = vmatprep.subr.bf16.mxu1 %v978_v0 }
 0x105   :  { %788 = vmatpush3.bf16.msra.mxu1 %v850_v27 }
 0x106   :  { %789 = vmatprep.subr.bf16.mxu1 %v978_v0 }
 0x109   :  { %790 = vmatpush3.bf16.msra.mxu1 %v851_v28 }
 0x10a   :  { %791 = vmatprep.subr.bf16.mxu1 %v978_v0 }
 0x10d   :  { %792 = vmatpush3.bf16.msra.mxu1 %v852_v29 }
 0x10e   :  { %793 = vmatprep.subr.bf16.mxu1 %v978_v0 }
 0x111   :  { %794 = vmatpush3.bf16.msra.mxu1 %v853_v30 }
 0x112   :  { %795 = vmatprep.subr.bf16.mxu1 %v978_v0 }
 0x115   :  { %796 = vmatpush3.bf16.msra.mxu1 %v854_v39 }
 0x116   :  { %797 = vmatprep.subr.bf16.mxu1 %v978_v0 }
 0x119   :  { %798 = vmatpush3.bf16.msra.mxu1 %v855_v40 }
 0x1bc   :  { %v288_v32 = vpop.f32.mrf.mxu1 }
 0x1bd   :  { %v289_v33 = vadd.f32 %v663_v31, %v288_v32 }
 0x1be   :  { %v761_v34 = vpop.f32.mrf.mxu1 }
 0x1bf   :  { %v294_v35 = vmax.f32 %v289_v33, 0.0 }
 0x1c0   :  { %v291_v36 = vpop.f32.mrf.mxu1 }
 0x1c1   :  { %v295_v37 = vpack.c.bf16 %v294_v35, %v294_v35 }
 0x1c2   :  { %v762_v38 = vpop.f32.mrf.mxu1 }
 0x1c3   :  { %780 = vmatmul.mubr.bf16.vlgmr.msra.gmra.mxu0 %v295_v37 }
 0x1c4   :  { %819 = vmatprep.mubr.msk.bf16.mxu0 %vm979_vm0, %v978_v0  ;;  %804 = vmatpush3.bf16.msra.mxu0 %v856_v41 }
 0x1c5   :  { %805 = vmatprep.subr.bf16.mxu0 %v978_v0 }
 0x1c8   :  { %806 = vmatpush3.bf16.msra.mxu0 %v857_v42 }
 0x1c9   :  { %807 = vmatprep.subr.bf16.mxu0 %v978_v0 }
 0x1cc   :  { %808 = vmatpush3.bf16.msra.mxu0 %v858_v43 }
 0x1cd   :  { %809 = vmatprep.subr.bf16.mxu0 %v978_v0 }
 0x1d0   :  { %810 = vmatpush3.bf16.msra.mxu0 %v859_v44 }
 0x1d1   :  { %811 = vmatprep.subr.bf16.mxu0 %v978_v0 }
 0x1d4   :  { %812 = vmatpush3.bf16.msra.mxu0 %v860_v45 }
 0x1d5   :  { %813 = vmatprep.subr.bf16.mxu0 %v978_v0 }
 0x1d8   :  { %814 = vmatpush3.bf16.msra.mxu0 %v861_v46 }
 0x1d9   :  { %815 = vmatprep.subr.bf16.mxu0 %v978_v0 }
 0x1dc   :  { %816 = vmatpush3.bf16.msra.mxu0 %v862_v55 }
 0x1dd   :  { %817 = vmatprep.subr.bf16.mxu0 %v978_v0 }
 0x1e0   :  { %818 = vmatpush3.bf16.msra.mxu0 %v863_v56 }
 0x283   :  { %v401_v48 = vpop.f32.mrf.mxu0 }
 0x284   :  { %v402_v49 = vadd.f32 %v672_v47, %v401_v48 }
 0x285   :  { %v781_v50 = vpop.f32.mrf.mxu0 }
 0x286   :  { %v407_v51 = vmax.f32 %v402_v49, 0.0 }
 0x287   :  { %v404_v52 = vpop.f32.mrf.mxu0 }
 0x288   :  { %v408_v53 = vpack.c.bf16 %v407_v51, %v407_v51 }
 0x289   :  { %v782_v54 = vpop.f32.mrf.mxu0 }
 0x28a   :  { %800 = vmatmul.mubr.bf16.vlgmr.msra.gmra.mxu1 %v408_v53 }
 0x34a   :  { %v514_v58 = vpop.f32.mrf.mxu1 }
 0x34b   :  { %v515_v59 = vadd.f32 %v681_v57, %v514_v58 }
 0x34c   :  { %v801_v60 = vpop.f32.mrf.mxu1 }
 0x34d   :  { %v520_v61 = vmax.f32 %v515_v59, 0.0 }
 0x34e   :  { %v517_v62 = vpop.f32.mrf.mxu1 }
 0x34f   :  { %v521_v63 = vpack.c.bf16 %v520_v61, %v520_v61 }
 0x350   :  { %v802_v1 = vpop.f32.mrf.mxu1 }
 0x351   :  { %820 = vmatmul.mubr.bf16.vlgmr.msra.gmra.mxu0 %v521_v63 }
 0x411   :  { %v627_v3 = vpop.f32.mrf.mxu0 }
 0x412   :  { %v628_v0 = vadd.f32 %v690_v2, %v627_v3 }
 0x413   :  { %v821_v4 = vpop.f32.mrf.mxu0 }
 0x414   :  { %v633_v5 = vmax.f32 %v628_v0, 0.0 }
 0x415   :  { %v630_v7 = vpop.f32.mrf.mxu0 }
 0x416   :  { %v635_v8 = vsub.f32 1.0, %v633_v5 }
 0x417   :  { %v822_v9 = vpop.f32.mrf.mxu0 }
 0x418   :  { %v642_v10 = vmul.f32 %v699_v6, %v635_v8 }
 0x41a   :  { %643 = vst [vmem:[#allocation10] sm:$0xff] %v642_v10 }
 0x41b   :  { %955 = shalt.err (!%p952_p10)
}
 0x41c   :  { %653 = dma.vmem_to_hbm [thread:$0]  %s651_s14, 128, %s1152_s12, [#allocation4]  }
 0x41d   :  { %970 = dma.done.wait [#allocation4], 128  }
 0x41e   :  { %971 = vsyncadd [#allocation4], 4294967168 }
 0x41f   :  { %657 = vsyncpa [#allocation3], 1 }
 0x420   :  { %658 = vsyncpa [#allocation6], 1 }
 0x421   :  { %659 = vsyncpa [#allocation9], 1 }
 0x422   :  { %660 = vsyncpa [#allocation4], 1 }

</bundles_post_ra>
